<compile_context>
chip_gen: v7x
topology: tpu7x:2x2x1
jax: 0.10.0
libtpu: 0.0.40
codegen_flags: <defaults>
</compile_context>

<pallas_src>
import functools
import math

import jax
import jax.numpy as jnp
from jax.experimental import pallas as pl
from jax.experimental.pallas import tpu as pltpu

# ----------------------------- config (DictConfig stand-in) -----------------
CFG = dict(
    mlp_hidden_dims=(32, 32),
    mlp_activation="elu",
    action_scale=1.0,
    use_log_std_clip=True,
    log_std_clip_min=-20.0,
    log_std_clip_max=2.0,
    use_action_clip=True,
    action_clip=1.0,
    use_init=True,
)

LOG_2PI = math.log(2.0 * math.pi)
LANES = 128  # lane width of the action head / packed output slab


def _elu(x):
    # nn.ELU(alpha=1.0); clamp the exp argument so the unselected branch never overflows
    return jnp.where(x > 0, x, jnp.exp(jnp.minimum(x, 0.0)) - 1.0)


def _round_up(x, m):
    return ((x + m - 1) // m) * m


# ----------------------------- Pallas kernel --------------------------------
def actor_sac_kernel(
    state_ref, eps_ref,
    w1_ref, b1_ref, w2_ref, b2_ref, wm_ref, std_scatter_ref, const_ref,
    out_ref,
    *, action_dim, action_scale, action_clip, use_action_clip,
):
    A = action_dim

    # ---- backbone MLP: Linear + ELU per hidden layer.
    # bf16 MXU matmuls, f32 accumulation, f32 elementwise tail.
    x = state_ref[...].astype(jnp.bfloat16)                       # (TB, S)
    h = jnp.dot(x, w1_ref[...], preferred_element_type=jnp.float32) + b1_ref[...]
    h = _elu(h)
    h = jnp.dot(h.astype(jnp.bfloat16), w2_ref[...],
                preferred_element_type=jnp.float32) + b2_ref[...]
    h = _elu(h)

    # ---- constant bank (one (8,128) vreg tile), pad lanes are zero:
    #   row 0: mean-layer bias bm            (lanes >= A : 0)
    #   row 1: 1/std                         (lanes >= A : 0)
    #   row 2: -(log_std + 0.5*log(2*pi))    (lanes >= A : 0)
    cb = const_ref[...]
    bm = cb[0:1, :]
    inv_std = cb[1:2, :]
    neg_log_term = cb[2:3, :]

    # ---- mean head, lane-padded to 128 (wm/bm pad columns are zero -> mean pad lanes == 0)
    mean = jnp.dot(h.astype(jnp.bfloat16), wm_ref[...],
                   preferred_element_type=jnp.float32) + bm
    mean = action_scale * jnp.tanh(mean)                           # (TB, 128)

    # ---- rsample: std * eps scattered into lanes 0..A-1 by a tiny diag(std) matmul
    # (eps arrives as its natural (TB, A) shape; no padded HBM stream).
    noise = jnp.dot(eps_ref[...], std_scatter_ref[...],
                    preferred_element_type=jnp.float32)            # (TB, 128), pad lanes 0
    action = mean + noise
    if use_action_clip:
        action = jnp.clip(action, -action_clip, action_clip)
    # pad lanes: mean == 0 and noise == 0 -> action == 0 (clip keeps 0)

    # ---- Normal(mean, std).log_prob(action).sum(-1, keepdim=True)
    # pad lanes contribute exactly 0 (z == 0 and neg_log_term == 0 there).
    z = (action - mean) * inv_std
    logp = jnp.sum(-0.5 * (z * z) + neg_log_term, axis=-1, keepdims=True)   # (TB, 1)

    # ---- pack everything into ONE lane-dense 128-wide slab:
    #   lanes [0..A-1]  = action        (action is zero outside these lanes)
    #   lanes [A..2A-1] = mean          (roll by A; zero elsewhere)
    #   lane  [2A]      = log_prob
    lane = jax.lax.broadcasted_iota(jnp.int32, mean.shape, 1)
    mean_shift = pltpu.roll(mean, shift=A, axis=1)                 # zero outside A..2A-1
    packed = action + mean_shift + jnp.where(lane == 2 * A, logp, 0.0)
    out_ref[...] = packed                                          # one unmasked 128-lane store


# ----------------------------- wrapper ---------------------------------------
def actor_sac_forward(params, state, eps, *, tile_b=1024):
    """params: dict of f32 weights; state: (B, S) f32; eps: (B, A) f32 standard normal."""
    B, S = state.shape
    A = int(params["bm"].shape[-1])
    H1 = int(params["b1"].shape[-1])
    H2 = int(params["b2"].shape[-1])
    assert eps.shape == (B, A)
    assert 2 * A < LANES, "packed output layout needs 2*A + 1 <= 128 lanes"

    f32, bf16 = jnp.float32, jnp.bfloat16

    # ---- batch tiling: >= 2 grid steps whenever possible (v7x megacore),
    # tile rows multiple of 8, large tiles to amortize per-step overhead.
    B_pad = _round_up(B, 8)
    if B_pad > tile_b:
        TB = tile_b
    elif B_pad >= 16:
        TB = _round_up(pl.cdiv(B_pad, 2), 8)   # split small batches across 2 tiles
    else:
        TB = B_pad
    B_full = _round_up(B_pad, TB)
    grid = (B_full // TB,)

    # ---- parameter prep (once per call; all tiny): pad head to 128 lanes,
    # cast matmul weights to bf16.
    w1 = params["w1"].astype(bf16)
    w2 = params["w2"].astype(bf16)
    b1 = params["b1"].reshape(1, H1).astype(f32)
    b2 = params["b2"].reshape(1, H2).astype(f32)
    wm = jnp.zeros((H2, LANES), f32).at[:, :A].set(params["wm"]).astype(bf16)

    log_std = params["log_std"].reshape(A).astype(f32)
    if CFG["use_log_std_clip"]:
        log_std = jnp.clip(log_std, CFG["log_std_clip_min"], CFG["log_std_clip_max"])
    std = jnp.exp(log_std)

    # diag(std) scatter matrix: (A, 128), std on the diagonal, zeros elsewhere.
    idx = jnp.arange(A)
    std_scatter = jnp.zeros((A, LANES), f32).at[idx, idx].set(std)

    # constant bank: one (8, 128) tile -> single VMEM-resident operand.
    const = jnp.zeros((8, LANES), f32)
    const = const.at[0, :A].set(params["bm"].reshape(A).astype(f32))       # bm
    const = const.at[1, :A].set(jnp.exp(-log_std))                         # 1/std
    const = const.at[2, :A].set(-(log_std + 0.5 * LOG_2PI))                # log-prob const

    # ---- streamed inputs: feed directly; only materialize a padded copy when the
    # batch does not divide into tiles.
    if B_full != B:
        state_in = jnp.zeros((B_full, S), state.dtype).at[:B].set(state)
        eps_in = jnp.zeros((B_full, A), f32).at[:B].set(eps.astype(f32))
    else:
        state_in = state
        eps_in = eps.astype(f32)

    kernel = functools.partial(
        actor_sac_kernel,
        action_dim=A,
        action_scale=float(CFG["action_scale"]),
        action_clip=float(CFG["action_clip"]),
        use_action_clip=bool(CFG["use_action_clip"]),
    )

    row_map = lambda i: (i, 0)     # batch-tiled arrays
    const_map = lambda i: (0, 0)   # VMEM-resident weights / constants

    slab = pl.pallas_call(
        kernel,
        out_shape=jax.ShapeDtypeStruct((B_full, LANES), f32),
        grid_spec=pltpu.PrefetchScalarGridSpec(
            num_scalar_prefetch=0,
            grid=grid,
            in_specs=[
                pl.BlockSpec((TB, S), row_map),         # state (caller dtype, cast in-kernel)
                pl.BlockSpec((TB, A), row_map),         # eps (natural (B, A) shape)
                pl.BlockSpec((S, H1), const_map),       # w1 (bf16)
                pl.BlockSpec((1, H1), const_map),       # b1
                pl.BlockSpec((H1, H2), const_map),      # w2 (bf16)
                pl.BlockSpec((1, H2), const_map),       # b2
                pl.BlockSpec((H2, LANES), const_map),   # wm (bf16, lane-padded with zeros)
                pl.BlockSpec((A, LANES), const_map),    # diag(std) scatter
                pl.BlockSpec((8, LANES), const_map),    # const bank [bm; 1/std; -(log_std+c)]
            ],
            out_specs=pl.BlockSpec((TB, LANES), row_map),
        ),
        compiler_params=pltpu.CompilerParams(
            dimension_semantics=("parallel",),
        ),
    )(state_in, eps_in, w1, b1, w2, b2, wm, std_scatter, const)

    return {
        "action": slab[:B, 0:A],
        "mu": slab[:B, A:2 * A],
        "log_prob": slab[:B, 2 * A:2 * A + 1],
    }


# ----------------------------- deterministic params -------------------------
def make_params(key, state_dim, hidden_dims, action_dim):
    k1, k2, k3 = jax.random.split(key, 3)
    h1, h2 = hidden_dims

    def linear_init(k, fan_in, fan_out, gain):
        # deterministic synthetic init (stands in for init_layers orthogonal init)
        w = gain * jax.random.normal(k, (fan_in, fan_out), jnp.float32) / jnp.sqrt(fan_in)
        b = jnp.zeros((1, fan_out), jnp.float32)
        return w, b

    w1, b1 = linear_init(k1, state_dim, h1, gain=1.0)
    w2, b2 = linear_init(k2, h1, h2, gain=1.0)
    wm, bm = linear_init(k3, h2, action_dim, gain=0.01)
    log_std = jnp.zeros((1, action_dim), jnp.float32)  # nn.Parameter(torch.zeros(A))
    return dict(w1=w1, b1=b1, w2=w2, b2=b2, wm=wm, bm=bm, log_std=log_std)


# ----------------------------- reference (plain JAX, f32) --------------------
def actor_sac_ref(params, state, eps):
    h = _elu(state @ params["w1"] + params["b1"])
    h = _elu(h @ params["w2"] + params["b2"])
    mean = CFG["action_scale"] * jnp.tanh(h @ params["wm"] + params["bm"])
    log_std = params["log_std"]
    if CFG["use_log_std_clip"]:
        log_std = jnp.clip(log_std, CFG["log_std_clip_min"], CFG["log_std_clip_max"])
    std = jnp.exp(log_std)
    action = mean + std * eps
    if CFG["use_action_clip"]:
        action = jnp.clip(action, -CFG["action_clip"], CFG["action_clip"])
    z = (action - mean) / std
    logp = jnp.sum(-0.5 * z * z - log_std - 0.5 * LOG_2PI, axis=-1, keepdims=True)
    return {"action": action, "log_prob": logp, "mu": mean}


if __name__ == "__main__":
    # small, module-consistent shapes: batch=64, state_dim=32, hidden=(32,32), action_dim=4
    B, S, A = 64, 32, 4
    key = jax.random.PRNGKey(0)
    k_param, k_state, k_eps = jax.random.split(key, 3)

    params = make_params(k_param, S, CFG["mlp_hidden_dims"], A)
    state = jax.random.normal(k_state, (B, S), jnp.float32)
    eps = jax.random.normal(k_eps, (B, A), jnp.float32)  # reparameterization noise

    out = actor_sac_forward(params, state, eps)
    jax.block_until_ready(out)

    ref = actor_sac_ref(params, state, eps)
    for k in ("action", "log_prob", "mu"):
        assert out[k].shape == ref[k].shape, (k, out[k].shape, ref[k].shape)
        err = float(jnp.max(jnp.abs(out[k] - ref[k])))
        # bf16 matmuls with f32 accumulation vs. a pure-f32 reference
        assert jnp.allclose(out[k], ref[k], atol=1e-2, rtol=1e-2), (k, err)

    print("KERNEL_OK")
</pallas_src>

<mosaic_0001>
module attributes {stable_mosaic.version = 11 : i64} {
  func.func @actor_sac_kernel(%arg0: i32, %arg1: memref<32x32xf32, #tpu.memory_space<vmem>>, %arg2: memref<32x4xf32, #tpu.memory_space<vmem>>, %arg3: memref<32x32xbf16, #tpu.memory_space<vmem>>, %arg4: memref<1x32xf32, #tpu.memory_space<vmem>>, %arg5: memref<32x32xbf16, #tpu.memory_space<vmem>>, %arg6: memref<1x32xf32, #tpu.memory_space<vmem>>, %arg7: memref<32x128xbf16, #tpu.memory_space<vmem>>, %arg8: memref<4x128xf32, #tpu.memory_space<vmem>>, %arg9: memref<8x128xf32, #tpu.memory_space<vmem>>, %arg10: memref<32x128xf32, #tpu.memory_space<vmem>>) attributes {dimension_semantics = [#tpu.dimension_semantics<parallel>], iteration_bounds = array<i64: 2>, scalar_prefetch = 0 : i64, scratch_operands = 0 : i64, tpu.core_type = #tpu.core_type<tc>, window_params = [{transform_indices = @transform_0, window_bounds = array<i64: 32, 32>}, {transform_indices = @transform_1, window_bounds = array<i64: 32, 4>}, {pipeline_mode = #tpu.pipeline_mode<synchronous>, transform_indices = @transform_2, window_bounds = array<i64: 32, 32>}, {pipeline_mode = #tpu.pipeline_mode<synchronous>, transform_indices = @transform_3, window_bounds = array<i64: 1, 32>}, {pipeline_mode = #tpu.pipeline_mode<synchronous>, transform_indices = @transform_4, window_bounds = array<i64: 32, 32>}, {pipeline_mode = #tpu.pipeline_mode<synchronous>, transform_indices = @transform_5, window_bounds = array<i64: 1, 32>}, {pipeline_mode = #tpu.pipeline_mode<synchronous>, transform_indices = @transform_6, window_bounds = array<i64: 32, 128>}, {pipeline_mode = #tpu.pipeline_mode<synchronous>, transform_indices = @transform_7, window_bounds = array<i64: 4, 128>}, {pipeline_mode = #tpu.pipeline_mode<synchronous>, transform_indices = @transform_8, window_bounds = array<i64: 8, 128>}, {transform_indices = @transform_9, window_bounds = array<i64: 32, 128>}]} {
    %c0 = arith.constant 0 : index
    %c0_0 = arith.constant 0 : index
    %0 = vector.load %arg1[%c0, %c0_0] : memref<32x32xf32, #tpu.memory_space<vmem>>, vector<32x32xf32>
    %1 = arith.truncf %0 : vector<32x32xf32> to vector<32x32xbf16>
    %c0_1 = arith.constant 0 : index
    %c0_2 = arith.constant 0 : index
    %2 = vector.load %arg3[%c0_1, %c0_2] : memref<32x32xbf16, #tpu.memory_space<vmem>>, vector<32x32xbf16>
    %cst = arith.constant dense<0.000000e+00> : vector<32x32xf32>
    %3 = tpu.matmul %1, %2, %cst {dimension_numbers = #tpu.dot_dimension_numbers<[1], [0], [0], [1], [0, 0, 1, 1], [], []>} : vector<32x32xbf16>, vector<32x32xbf16>, vector<32x32xf32> -> vector<32x32xf32>
    %c0_3 = arith.constant 0 : index
    %c0_4 = arith.constant 0 : index
    %4 = vector.load %arg4[%c0_3, %c0_4] : memref<1x32xf32, #tpu.memory_space<vmem>>, vector<1x32xf32>
    %5 = vector.broadcast %4 : vector<1x32xf32> to vector<32x32xf32>
    %6 = arith.addf %3, %5 : vector<32x32xf32>
    %cst_5 = arith.constant 0.000000e+00 : f32
    %7 = vector.broadcast %cst_5 : f32 to vector<32x32xf32>
    %8 = arith.cmpf ogt, %6, %7 : vector<32x32xf32>
    %cst_6 = arith.constant 0.000000e+00 : f32
    %9 = vector.broadcast %cst_6 : f32 to vector<32x32xf32>
    %10 = arith.minimumf %6, %9 : vector<32x32xf32>
    %11 = math.exp %10 : vector<32x32xf32>
    %cst_7 = arith.constant 1.000000e+00 : f32
    %12 = vector.broadcast %cst_7 : f32 to vector<32x32xf32>
    %13 = arith.subf %11, %12 : vector<32x32xf32>
    %14 = arith.select %8, %6, %13 : vector<32x32xi1>, vector<32x32xf32>
    %15 = arith.truncf %14 : vector<32x32xf32> to vector<32x32xbf16>
    %c0_8 = arith.constant 0 : index
    %c0_9 = arith.constant 0 : index
    %16 = vector.load %arg5[%c0_8, %c0_9] : memref<32x32xbf16, #tpu.memory_space<vmem>>, vector<32x32xbf16>
    %cst_10 = arith.constant dense<0.000000e+00> : vector<32x32xf32>
    %17 = tpu.matmul %15, %16, %cst_10 {dimension_numbers = #tpu.dot_dimension_numbers<[1], [0], [0], [1], [0, 0, 1, 1], [], []>} : vector<32x32xbf16>, vector<32x32xbf16>, vector<32x32xf32> -> vector<32x32xf32>
    %c0_11 = arith.constant 0 : index
    %c0_12 = arith.constant 0 : index
    %18 = vector.load %arg6[%c0_11, %c0_12] : memref<1x32xf32, #tpu.memory_space<vmem>>, vector<1x32xf32>
    %19 = vector.broadcast %18 : vector<1x32xf32> to vector<32x32xf32>
    %20 = arith.addf %17, %19 : vector<32x32xf32>
    %cst_13 = arith.constant 0.000000e+00 : f32
    %21 = vector.broadcast %cst_13 : f32 to vector<32x32xf32>
    %22 = arith.cmpf ogt, %20, %21 : vector<32x32xf32>
    %cst_14 = arith.constant 0.000000e+00 : f32
    %23 = vector.broadcast %cst_14 : f32 to vector<32x32xf32>
    %24 = arith.minimumf %20, %23 : vector<32x32xf32>
    %25 = math.exp %24 : vector<32x32xf32>
    %cst_15 = arith.constant 1.000000e+00 : f32
    %26 = vector.broadcast %cst_15 : f32 to vector<32x32xf32>
    %27 = arith.subf %25, %26 : vector<32x32xf32>
    %28 = arith.select %22, %20, %27 : vector<32x32xi1>, vector<32x32xf32>
    %c0_16 = arith.constant 0 : index
    %c0_17 = arith.constant 0 : index
    %29 = vector.load %arg9[%c0_16, %c0_17] : memref<8x128xf32, #tpu.memory_space<vmem>>, vector<8x128xf32>
    %30 = vector.extract_strided_slice %29 {offsets = [0, 0], sizes = [1, 128], strides = [1, 1]} : vector<8x128xf32> to vector<1x128xf32>
    %31 = vector.extract_strided_slice %29 {offsets = [1, 0], sizes = [1, 128], strides = [1, 1]} : vector<8x128xf32> to vector<1x128xf32>
    %32 = vector.extract_strided_slice %29 {offsets = [2, 0], sizes = [1, 128], strides = [1, 1]} : vector<8x128xf32> to vector<1x128xf32>
    %33 = arith.truncf %28 : vector<32x32xf32> to vector<32x32xbf16>
    %c0_18 = arith.constant 0 : index
    %c0_19 = arith.constant 0 : index
    %34 = vector.load %arg7[%c0_18, %c0_19] : memref<32x128xbf16, #tpu.memory_space<vmem>>, vector<32x128xbf16>
    %cst_20 = arith.constant dense<0.000000e+00> : vector<32x128xf32>
    %35 = tpu.matmul %33, %34, %cst_20 {dimension_numbers = #tpu.dot_dimension_numbers<[1], [0], [0], [1], [0, 0, 1, 1], [], []>} : vector<32x32xbf16>, vector<32x128xbf16>, vector<32x128xf32> -> vector<32x128xf32>
    %36 = vector.broadcast %30 : vector<1x128xf32> to vector<32x128xf32>
    %37 = arith.addf %35, %36 : vector<32x128xf32>
    %38 = math.tanh %37 : vector<32x128xf32>
    %cst_21 = arith.constant 1.000000e+00 : f32
    %39 = vector.broadcast %cst_21 : f32 to vector<32x128xf32>
    %40 = arith.mulf %39, %38 : vector<32x128xf32>
    %c0_22 = arith.constant 0 : index
    %c0_23 = arith.constant 0 : index
    %41 = vector.load %arg2[%c0_22, %c0_23] : memref<32x4xf32, #tpu.memory_space<vmem>>, vector<32x4xf32>
    %c0_24 = arith.constant 0 : index
    %c0_25 = arith.constant 0 : index
    %42 = vector.load %arg8[%c0_24, %c0_25] : memref<4x128xf32, #tpu.memory_space<vmem>>, vector<4x128xf32>
    %cst_26 = arith.constant dense<0.000000e+00> : vector<32x128xf32>
    %43 = tpu.matmul %41, %42, %cst_26 {dimension_numbers = #tpu.dot_dimension_numbers<[1], [0], [0], [1], [0, 0, 1, 1], [], []>} : vector<32x4xf32>, vector<4x128xf32>, vector<32x128xf32> -> vector<32x128xf32>
    %44 = arith.addf %40, %43 : vector<32x128xf32>
    %cst_27 = arith.constant -1.000000e+00 : f32
    %cst_28 = arith.constant 1.000000e+00 : f32
    %45 = vector.broadcast %cst_27 : f32 to vector<32x128xf32>
    %46 = arith.maximumf %45, %44 : vector<32x128xf32>
    %47 = vector.broadcast %cst_28 : f32 to vector<32x128xf32>
    %48 = arith.minimumf %47, %46 : vector<32x128xf32>
    %49 = arith.subf %48, %40 : vector<32x128xf32>
    %50 = vector.broadcast %31 : vector<1x128xf32> to vector<32x128xf32>
    %51 = arith.mulf %49, %50 : vector<32x128xf32>
    %52 = arith.mulf %51, %51 : vector<32x128xf32>
    %cst_29 = arith.constant -5.000000e-01 : f32
    %53 = vector.broadcast %cst_29 : f32 to vector<32x128xf32>
    %54 = arith.mulf %53, %52 : vector<32x128xf32>
    %55 = vector.broadcast %32 : vector<1x128xf32> to vector<32x128xf32>
    %56 = arith.addf %54, %55 : vector<32x128xf32>
    %cst_30 = arith.constant dense<0.000000e+00> : vector<32xf32>
    %57 = vector.multi_reduction <add>, %56, %cst_30 [1] : vector<32x128xf32> to vector<32xf32>
    %58 = vector.shape_cast %57 : vector<32xf32> to vector<32x1xf32>
    %59 = tpu.iota {dimensions = array<i32: 1>} : vector<32x128xi32>
    %c4_i32 = arith.constant 4 : i32
    %60 = tpu.dynamic_rotate %40 by %c4_i32 dim 1 : vector<32x128xf32>, i32 -> vector<32x128xf32>
    %61 = arith.addf %48, %60 : vector<32x128xf32>
    %c8_i32 = arith.constant 8 : i32
    %62 = vector.broadcast %c8_i32 : i32 to vector<32x128xi32>
    %63 = arith.cmpi eq, %59, %62 : vector<32x128xi32>
    %cst_31 = arith.constant 0.000000e+00 : f32
    %64 = vector.shape_cast %58 : vector<32x1xf32> to vector<32x1xf32>
    %65 = vector.broadcast %64 : vector<32x1xf32> to vector<32x128xf32>
    %66 = vector.broadcast %cst_31 : f32 to vector<32x128xf32>
    %67 = arith.select %63, %65, %66 : vector<32x128xi1>, vector<32x128xf32>
    %68 = arith.addf %61, %67 : vector<32x128xf32>
    %c0_32 = arith.constant 0 : index
    %c0_33 = arith.constant 0 : index
    %69 = vector.load %arg10[%c0_32, %c0_33] : memref<32x128xf32, #tpu.memory_space<vmem>>, vector<32x128xf32>
    tpu.vector_store %arg10[%c0_32, %c0_33], %68 {strides = array<i32>} : memref<32x128xf32, #tpu.memory_space<vmem>>, vector<32x128xf32>,
    return
  }
  func.func @transform_0(%arg0: i32) -> (i32, i32) {
    %c0_i32 = arith.constant 0 : i32
    %c0_i32_0 = arith.constant 0 : i32
    return %arg0, %c0_i32 : i32, i32
  }
  func.func @transform_1(%arg0: i32) -> (i32, i32) {
    %c0_i32 = arith.constant 0 : i32
    %c0_i32_0 = arith.constant 0 : i32
    return %arg0, %c0_i32 : i32, i32
  }
  func.func @transform_2(%arg0: i32) -> (i32, i32) {
    %c0_i32 = arith.constant 0 : i32
    %c0_i32_0 = arith.constant 0 : i32
    %c0_i32_1 = arith.constant 0 : i32
    return %c0_i32, %c0_i32_0 : i32, i32
  }
  func.func @transform_3(%arg0: i32) -> (i32, i32) {
    %c0_i32 = arith.constant 0 : i32
    %c0_i32_0 = arith.constant 0 : i32
    %c0_i32_1 = arith.constant 0 : i32
    return %c0_i32, %c0_i32_0 : i32, i32
  }
  func.func @transform_4(%arg0: i32) -> (i32, i32) {
    %c0_i32 = arith.constant 0 : i32
    %c0_i32_0 = arith.constant 0 : i32
    %c0_i32_1 = arith.constant 0 : i32
    return %c0_i32, %c0_i32_0 : i32, i32
  }
  func.func @transform_5(%arg0: i32) -> (i32, i32) {
    %c0_i32 = arith.constant 0 : i32
    %c0_i32_0 = arith.constant 0 : i32
    %c0_i32_1 = arith.constant 0 : i32
    return %c0_i32, %c0_i32_0 : i32, i32
  }
  func.func @transform_6(%arg0: i32) -> (i32, i32) {
    %c0_i32 = arith.constant 0 : i32
    %c0_i32_0 = arith.constant 0 : i32
    %c0_i32_1 = arith.constant 0 : i32
    return %c0_i32, %c0_i32_0 : i32, i32
  }
  func.func @transform_7(%arg0: i32) -> (i32, i32) {
    %c0_i32 = arith.constant 0 : i32
    %c0_i32_0 = arith.constant 0 : i32
    %c0_i32_1 = arith.constant 0 : i32
    return %c0_i32, %c0_i32_0 : i32, i32
  }
  func.func @transform_8(%arg0: i32) -> (i32, i32) {
    %c0_i32 = arith.constant 0 : i32
    %c0_i32_0 = arith.constant 0 : i32
    %c0_i32_1 = arith.constant 0 : i32
    return %c0_i32, %c0_i32_0 : i32, i32
  }
  func.func @transform_9(%arg0: i32) -> (i32, i32) {
    %c0_i32 = arith.constant 0 : i32
    %c0_i32_0 = arith.constant 0 : i32
    return %arg0, %c0_i32 : i32, i32
  }
}

</mosaic_0001>

<bundles_post_ra>
// kernel: tpu_custom_call.1
= control target key start
LH: loop header
LB: loop body
LE: loop exit
PB: predicated region body
PF: predicated region fallthrough
CT: control target
= control target key end

     0   :  { %14 = vsyncpa [#allocation3], 0  ;;  %s1364_s0 = inlined_call_operand.vmem [shape: f32[64,32], index: 0, kind: input, shape index: {}]   ;;  %s1365_s1 = inlined_call_operand.vmem [shape: f32[64,4], index: 1, kind: input, shape index: {}]   ;;  %s1366_s2 = inlined_call_operand.vmem [shape: bf16[32,32], index: 2, kind: input, shape index: {}]   ;;  %s1367_s3 = inlined_call_operand.vmem [shape: f32[1,32], index: 3, kind: input, shape index: {}]   ;;  %s1368_s4 = inlined_call_operand.vmem [shape: bf16[32,32], index: 4, kind: input, shape index: {}]   ;;  %s1369_s5 = inlined_call_operand.vmem [shape: f32[1,32], index: 5, kind: input, shape index: {}]   ;;  %s1370_s6 = inlined_call_operand.vmem [shape: bf16[32,128], index: 6, kind: input, shape index: {}]   ;;  %s1371_s7 = inlined_call_operand.vmem [shape: f32[4,128], index: 7, kind: input, shape index: {}]   ;;  %s1372_s8 = inlined_call_operand.vmem [shape: f32[8,128], index: 8, kind: input, shape index: {}]   ;;  %s1373_s9 = inlined_call_operand.hbm [shape: f32[64,128], index: 9, kind: output, shape index: {}]  }
   0x1   :  { %16 = vsyncpa [#allocation3 + $0x1], 0  ;;  %s1207_s30 = smov 0   ;;  %s1209_s10 = smov 0  }
   0x2   :  { %s1211_s11 = smov 0   ;;  %s1213_s12 = smov 0  }
   0x3 LB: > { %s1228_s13 = sadd.s32 4294967295, %s1151_s12   ;;  %s922_s14 = sadd.s32 4294967294, %s1151_s12   ;;  %s1151_s12 = sphi %s1213_s12, %s1379_s12   ;;  %s1147_s11 = sphi %s1211_s11, %s1378_s11   ;;  %s1143_s10 = sphi %s1209_s10, %s1377_s10   ;;  %s1139_s30 = sphi %s1207_s30, %s1376_s30  }
   0x4   : > { %s1232_s15 = sadd.s32 1, %s1151_s12   ;;  %s228_s16 = sadd.s32 1, %s1147_s11 }
   0x5   : > { %s225_s17 = ssub.s32 %s1151_s12, %s1232_s15  ;;  %p238_p0 = scmp.ne.s32.totalorder %s1147_s11, %s1143_s10 }
   0x6   : > { %p226_p1 = scmp.eq.s32.totalorder %s225_s17, 0  ;;  %p239_p2 = scmp.eq.s32.totalorder %s1228_s13, 1 }
   0x7   : > { %p244_p3 = scmp.ne.s32.totalorder %s1143_s10, %s1139_s30  ;;  %p245_p4 = scmp.eq.s32.totalorder %s922_s14, 1 }
   0x8   : > { %s1243_s18 = scalar_select %p226_p1, %s1147_s11, %s228_s16  }
   0x9   : > { %p1245_p5 = por %p239_p2, %p238_p0  ;;  %p1249_p6 = por %p245_p4, %p244_p3 }
   0xa   : > { %p925_p7 = scmp.ge.s32.totalorder %s1151_s12, 1  ;;  %p302_p8 = scmp.lt.s32.totalorder %s1151_s12, 3 }
   0xc   : > { %p303_p9 = pnand %p925_p7, %p302_p8 }
   0xd   : > { %v1059_v0 = vld [vmem:[%s1366_s2] sm:$0xff] (!%p303_p9)   ;;  %s927_s23 = sshll.u32 (!%p303_p9), %s1228_s13, 2  ;;  %v1060_v1 = vld [vmem:[%s1366_s2 + $0x8] sm:$0xff] (!%p303_p9)   ;;  %vm386_vm0 = vcmask (!%p303_p9), 261120   ;;  %vm670_vm5 = vcmask (!%p303_p9), 1043456   ;;  %vm657_vm6 = vcmask (!%p303_p9), 31744  }
   0xe   : > { %306 = sbr.rel (%p303_p9) target bundleno = 920 (0x398), region = 56  ;;  %p344_p10 = scmp.lt.s32.totalorder (!%p303_p9), %s927_s23, 7  ;;  %985 = vmatprep.subr.bf16.mxu0 (!%p303_p9), %v1059_v0  ;;  %v1061_v8 = vld [vmem:[%s1368_s4] sm:$0xff] (!%p303_p9)   ;;  %v1062_v9 = vld [vmem:[%s1368_s4 + $0x8] sm:$0xff] (!%p303_p9)  }
   0xf   : > { %986 = vmatpush3.bf16.msra.mxu0 (!%p303_p9), %v1059_v0  ;;  %993 = vmatprep.subr.bf16.mxu1 (!%p303_p9), %v1061_v8  ;;  %v931_v10 = vld [vmem:[%s1367_s3] ss:$0 sm:$0xff] (!%p303_p9)  ;;  %v1064_v42 = vld [vmem:[%s1370_s6 + $0x8] sm:$0xff] (!%p303_p9)   ;;  %s1153_s27 = smov (!%p303_p9), 4   ;;  %s340_s28 = sand.u32 (!%p303_p9), 1, %s1143_s10  }
  0x10   : > { %987 = vmatprep.subr.bf16.mxu0 (!%p303_p9), %v1060_v1  ;;  %994 = vmatpush3.bf16.msra.mxu1 (!%p303_p9), %v1061_v8  ;;  %v1063_v41 = vld [vmem:[%s1370_s6] sm:$0xff] (!%p303_p9)   ;;  %s967_s17 = sshll.u32 (!%p303_p9), %s1228_s13, 9  ;;  %s1323_s25 = scalar_lea.sflag (!%p303_p9), [#allocation3], %s340_s28 }
  0x11   : > { %995 = vmatprep.subr.bf16.mxu1 (!%p303_p9), %v1062_v9  ;;  %v656_v43 = vld [vmem:[%s1371_s7] sm:$0xf] (!%p303_p9)  ;;  %s1321_s24 = scalar_lea.hbm (!%p303_p9), %s1373_s9, %s967_s17 }
  0x12   : > { %v940_v48 = vld [vmem:[%s1369_s5] ss:$0 sm:$0xff] (!%p303_p9) }
  0x13   : > { %988 = vmatpush3.bf16.msra.mxu0 (!%p303_p9), %v1060_v1 }
  0x14   : > { %996 = vmatpush3.bf16.msra.mxu1 (!%p303_p9), %v1062_v9  ;;  %1001 = vmatprep.subr.bf16.mxu0 (!%p303_p9), %v1063_v41 }
  0x15   : > { %s1381_s23 = smov (!%p344_p10, %s927_s23), 7  ;;  %1009 = vmatprep.subr.msk.mxu1 %vm670_vm5, %v656_v43 }
  0x16   : > { %s928_s26 = sshll.u32 %s1381_s23, 3  ;;  %s1154_s23 = smov [#allocation2]  }
  0x17   : > { %s347_s29 = scalar_lea.vmem %s1364_s0, %s928_s26  ;;  %s353_s22 = scalar_lea.vmem %s1365_s1, %s928_s26 }
  0x18   : > { %v357_v2 = vld [vmem:[%s347_s29] sm:$0xff]  ;;  %v358_v3 = vld [vmem:[%s347_s29 + $0x8] sm:$0xff]  ;;  %v359_v4 = vld [vmem:[%s347_s29 + $0x10] sm:$0xff]  ;;  %s1093_s26 = sshll.u32 %s1154_s23, 4  ;;  %s1094_s26 = int_to_ptr.vmem [resolvable:$false] %s1093_s26 }
  0x19   : > { %v361_v5 = vpack.c.bf16 %v358_v3, %v357_v2  ;;  %v360_v6 = vld [vmem:[%s347_s29 + $0x18] sm:$0xff]  ;;  %v652_v44 = vld [vmem:[%s353_s22] sm:$0xff]  ;;  %v653_v45 = vld [vmem:[%s353_s22 + $0x8] sm:$0xff]  ;;  %s926_s29 = sshll.u32 %s340_s28, 5 }
  0x1a   : > { %v362_v7 = vpack.c.bf16 %v360_v6, %v359_v4  ;;  %v654_v46 = vld [vmem:[%s353_s22 + $0x10] sm:$0xff]  ;;  %v655_v47 = vld [vmem:[%s353_s22 + $0x18] sm:$0xff]  ;;  %s342_s14 = scalar_lea.vmem [#allocation2], %s926_s29 }
  0x1b   : > { %989 = vmatprep.mubr.msk.bf16.mxu0 %vm386_vm0, %v361_v5  ;;  %s848_s16 = sshll.u32 %s342_s14, 4  ;;  %s1316_s16 = int_to_ptr.vmem [resolvable:$true] %s848_s16 }
  0x1c   : > { %990 = vmatmul.mubr.msk.bf16.vlgmr.msra.gmra.mrb[0].mxu0 %vm386_vm0, %v362_v7  ;;  %s1089_s13 = scalar_lea.vmem %s1316_s16, 512  ;;  %p1096_p0 = scmp.lt.s32.totalorder %s1316_s16, %s1094_s26 }
  0x1d   : > { %1002 = vmatpush3.bf16.msra.mxu0 %v1063_v41  ;;  %p1090_p11 = scmp.ne.s32.totalorder %s1316_s16, %s1089_s13 }
  0x1e   : > { %1003 = vmatprep.subr.bf16.mxu0 %v1064_v42 }
  0x1f   : > { %p1091_p12 = pnand %p1090_p11, %p1245_p5 }
  0x21   : > { %1004 = vmatpush3.bf16.msra.mxu0 %v1064_v42  ;;  %p1092_p13 = pneg %p1091_p12 }
  0xef   : > { %v991_v11 = vpop.f32.mrb[0].mxu0 }
  0xf0   : > { %v436_v12 = vadd.f32 %v991_v11, %v931_v10  ;;  %v427_v13 = vpop.f32.mrb[1].mxu0 }
  0xf1   : > { %v428_v14 = vadd.f32 %v931_v10, %v427_v13  ;;  %v992_v15 = vpop.f32.mrb[2].mxu0 }
  0xf2   : > { %v448_v16 = vmin.f32 %v436_v12, 0.0  ;;  %v439_v17 = vadd.f32 %v992_v15, %v931_v10  ;;  %v430_v18 = vpop.f32.mrb[3].mxu0  ;;  %vm444_vm1 = vcmp.gt.f32.partialorder %v436_v12, 0.0 }
  0xf3   : > { %v446_v19 = vmin.f32 %v428_v14, 0.0  ;;  %v431_v20 = vadd.f32 %v931_v10, %v430_v18  ;;  %vm442_vm3 = vcmp.gt.f32.partialorder %v428_v14, 0.0 }
  0xf4   : > { %v454_v21 = vmul.f32 1.442695, %v448_v16  ;;  %v449_v22 = vmin.f32 %v439_v17, 0.0  ;;  %vm445_vm2 = vcmp.gt.f32.partialorder %v439_v17, 0.0 }
  0xf5   : > { %v450_v23 = vmul.f32 1.442695, %v446_v19  ;;  %v447_v24 = vmin.f32 %v431_v20, 0.0  ;;  %vm443_vm4 = vcmp.gt.f32.partialorder %v431_v20, 0.0  ;;  %v577_v19 = vlaneseq }
  0xf6   : > { %1065 = vpow2.f32 %v454_v21  ;;  %v456_v25 = vmul.f32 1.442695, %v449_v22  ;;  %v570_v22 = vld [vmem:[%s1372_s8] sm:$0xff] }
  0xf7   : > { %1067 = vpow2.f32 %v450_v23  ;;  %v452_v26 = vmul.f32 1.442695, %v447_v24 }
  0xf8   : > { %1069 = vpow2.f32 %v456_v25 }
  0xf9   : > { %1071 = vpow2.f32 %v452_v26 }
 0x100   : > { %v1066_v27 = vpop.eup %1065 }
 0x101   : > { %v1068_v28 = vpop.eup %1067  ;;  %v938_v29 = vadd.f32 -1.0, %v1066_v27 }
 0x102   : > { %v1070_v30 = vpop.eup %1069  ;;  %v936_v31 = vadd.f32 -1.0, %v1068_v28 }
 0x103   : > { %v1072_v32 = vpop.eup %1071  ;;  %v939_v33 = vadd.f32 -1.0, %v1070_v30  ;;  %v464_v35 = vsel %vm444_vm1, %v436_v12, %v938_v29 }
 0x104   : > { %v937_v34 = vadd.f32 -1.0, %v1072_v32  ;;  %v462_v38 = vsel %vm442_vm3, %v428_v14, %v936_v31 }
 0x105   : > { %v465_v36 = vsel %vm445_vm2, %v439_v17, %v939_v33 }
 0x106   : > { %v467_v37 = vpack.c.bf16 %v465_v36, %v464_v35  ;;  %v463_v39 = vsel %vm443_vm4, %v431_v20, %v937_v34  ;;  %v578_v20 = vshrl.u32 %v577_v19, 7 }
 0x107   : > { %v466_v40 = vpack.c.bf16 %v463_v39, %v462_v38 }
 0x108   : > { %v579_v21 = vsub.s32 0, %v578_v20  ;;  %v777_v32 = vsub.s32 1, %v578_v20 }
 0x109   : > { %997 = vmatprep.mubr.msk.bf16.mxu1 %vm386_vm0, %v466_v40 }
 0x10a   : > { %998 = vmatmul.mubr.msk.bf16.vlgmr.msra.gmra.mrb[0].mxu1 %vm386_vm0, %v467_v37  ;;  %v580_v23 = vrot.slane %v570_v22, %v579_v21  ;;  %v778_v41 = vrot.slane %v570_v22, %v777_v32 }
 0x10b   : > { %1010 = vmatpush3.msk.msra.mxu1 %vm670_vm5, %v656_v43  ;;  %1011 = vmatprep.mubr.msk.f32.mxu1 %vm657_vm6, %v652_v44 }
 0x112   : > { %1012 = vmatmul.mubr.msk.f32.vlgmr.msra.gmra.mrb[4].mxu1 %vm657_vm6, %v653_v45 }
 0x113   : > { %1014 = vmatprep.mubr.msk.f32.mxu1 %vm657_vm6, %v654_v46  ;;  %v793_v46 = vsub.s32 2, %v578_v20 }
 0x116   : > { %1015 = vmatmul.mubr.msk.f32.gmra.mrb[6].mxu1 %vm657_vm6, %v655_v47 }
 0x1dd   : > { %v999_v49 = vpop.f32.mrb[0].mxu1 }
 0x1de   : > { %v540_v50 = vadd.f32 %v999_v49, %v940_v48  ;;  %v531_v51 = vpop.f32.mrb[1].mxu1 }
 0x1df   : > { %v532_v52 = vadd.f32 %v940_v48, %v531_v51  ;;  %v1000_v53 = vpop.f32.mrb[2].mxu1 }
 0x1e0   : > { %v552_v54 = vmin.f32 %v540_v50, 0.0  ;;  %v543_v55 = vadd.f32 %v1000_v53, %v940_v48  ;;  %v534_v56 = vpop.f32.mrb[3].mxu1  ;;  %vm548_vm7 = vcmp.gt.f32.partialorder %v540_v50, 0.0 }
 0x1e1   : > { %v550_v57 = vmin.f32 %v532_v52, 0.0  ;;  %v535_v58 = vadd.f32 %v940_v48, %v534_v56  ;;  %vm546_vm9 = vcmp.gt.f32.partialorder %v532_v52, 0.0 }
 0x1e2   : > { %v558_v59 = vmul.f32 1.442695, %v552_v54  ;;  %v553_v60 = vmin.f32 %v543_v55, 0.0  ;;  %vm549_vm8 = vcmp.gt.f32.partialorder %v543_v55, 0.0  ;;  %v794_v54 = vrot.slane %v570_v22, %v793_v46 }
 0x1e3   : > { %v554_v61 = vmul.f32 1.442695, %v550_v57  ;;  %v551_v62 = vmin.f32 %v535_v58, 0.0  ;;  %vm547_vm10 = vcmp.gt.f32.partialorder %v535_v58, 0.0 }
 0x1e4   : > { %1073 = vpow2.f32 %v558_v59  ;;  %v560_v63 = vmul.f32 1.442695, %v553_v60 }
 0x1e5   : > { %1075 = vpow2.f32 %v554_v61  ;;  %v556_v0 = vmul.f32 1.442695, %v551_v62  ;;  %v1013_v15 = vpop.f32.mrb[4].mxu1 }
 0x1e6   : > { %1077 = vpow2.f32 %v560_v63  ;;  %v740_v16 = vpop.f32.mrb[5].mxu1 }
 0x1e7   : > { %1079 = vpow2.f32 %v556_v0 }
 0x1e9   : > { %v1016_v17 = vpop.f32.mrb[6].mxu1 }
 0x1ea   : > { %v750_v18 = vpop.f32.mrb[7].mxu1 }
 0x1ee   : > { %v1074_v1 = vpop.eup %1073 }
 0x1ef   : > { %v1076_v2 = vpop.eup %1075  ;;  %v947_v3 = vadd.f32 -1.0, %v1074_v1 }
 0x1f0   : > { %v1078_v4 = vpop.eup %1077  ;;  %v945_v5 = vadd.f32 -1.0, %v1076_v2 }
 0x1f1   : > { %v1080_v6 = vpop.eup %1079  ;;  %v948_v7 = vadd.f32 -1.0, %v1078_v4  ;;  %v568_v9 = vsel %vm548_vm7, %v540_v50, %v947_v3 }
 0x1f2   : > { %v946_v8 = vadd.f32 -1.0, %v1080_v6  ;;  %v566_v11 = vsel %vm546_vm9, %v532_v52, %v945_v5  ;;  %v808_v6 = vand.u32 127, %v577_v19 }
 0x1f3   : > { %v569_v10 = vsel %vm549_vm8, %v543_v55, %v948_v7 }
 0x1f4   : > { %v572_v12 = vpack.c.bf16 %v569_v10, %v568_v9  ;;  %v567_v13 = vsel %vm547_vm10, %v535_v58, %v946_v8  ;;  %vm821_vm11 = vcmp.eq.s32.totalorder %v808_v6, 8 }
 0x1f5   : > { %v571_v14 = vpack.c.bf16 %v567_v13, %v566_v11 }
 0x1f7   : > { %1005 = vmatprep.mubr.msk.bf16.mxu0 %vm386_vm0, %v571_v14 }
 0x1f8   : > { %1006 = vmatmul.mubr.msk.bf16.vlgmr.msra.gmra.mrb[4].mxu0 %vm386_vm0, %v572_v12 }
 0x2cb   : > { %v1007_v24 = vpop.f32.mrb[4].mxu0 }
 0x2cc   : > { %v642_v25 = vadd.f32 %v1007_v24, %v580_v23  ;;  %v633_v26 = vpop.f32.mrb[5].mxu0 }
 0x2cd   : > { %v634_v27 = vadd.f32 %v633_v26, %v580_v23  ;;  %v1008_v28 = vpop.f32.mrb[6].mxu0 }
 0x2ce   : > { %1081 = vtanh.f32 %v642_v25  ;;  %v645_v29 = vadd.f32 %v1008_v28, %v580_v23  ;;  %v636_v30 = vpop.f32.mrb[7].mxu0 }
 0x2cf   : > { %1083 = vtanh.f32 %v634_v27  ;;  %v637_v31 = vadd.f32 %v636_v30, %v580_v23 }
 0x2d0   : > { %1085 = vtanh.f32 %v645_v29 }
 0x2d1   : > { %1087 = vtanh.f32 %v637_v31 }
 0x2d8   : > { %v1082_v33 = vpop.eup %1081 }
 0x2d9   : > { %v1084_v34 = vpop.eup %1083  ;;  %v761_v35 = vadd.f32 %v1082_v33, %v750_v18 }
 0x2da   : > { %v1086_v36 = vpop.eup %1085  ;;  %v759_v37 = vadd.f32 %v1084_v34, %v740_v16 }
 0x2db   : > { %v1088_v38 = vpop.eup %1087  ;;  %v1306_v39 = vadd.f32 %v1086_v36, %v1016_v17  ;;  %v960_v40 = vclamps-f32 %v761_v35, 1.0 }
 0x2dc   : > { %v760_v42 = vadd.f32 %v1088_v38, %v1013_v15  ;;  %v958_v43 = vclamps-f32 %v759_v37, 1.0 }
 0x2dd   : > { %v961_v44 = vclamps-f32 %v1306_v39, 1.0  ;;  %v773_v45 = vsub.f32 %v960_v40, %v1082_v33 }
 0x2de   : > { %v959_v47 = vclamps-f32 %v760_v42, 1.0  ;;  %v771_v48 = vsub.f32 %v958_v43, %v1084_v34 }
 0x2df   : > { %v774_v49 = vsub.f32 %v961_v44, %v1086_v36  ;;  %v781_v50 = vmul.f32 %v778_v41, %v773_v45 }
 0x2e0   : > { %v772_v51 = vsub.f32 %v959_v47, %v1088_v38  ;;  %v779_v52 = vmul.f32 %v778_v41, %v771_v48 }
 0x2e1   : > { %v785_v53 = vmul.f32 %v781_v50, %v781_v50  ;;  %v782_v55 = vmul.f32 %v778_v41, %v774_v49 }
 0x2e2   : > { %v783_v56 = vmul.f32 %v779_v52, %v779_v52  ;;  %v780_v57 = vmul.f32 %v778_v41, %v772_v51 }
 0x2e3   : > { %v789_v58 = vmul.f32 -0.5, %v785_v53  ;;  %v786_v59 = vmul.f32 %v782_v55, %v782_v55 }
 0x2e4   : > { %v787_v60 = vmul.f32 -0.5, %v783_v56  ;;  %v784_v61 = vmul.f32 %v780_v57, %v780_v57 }
 0x2e5   : > { %v797_v62 = vadd.f32 %v794_v54, %v789_v58  ;;  %v790_v63 = vmul.f32 -0.5, %v786_v59 }
 0x2e6   : > { %v795_v0 = vadd.f32 %v794_v54, %v787_v60  ;;  %v788_v1 = vmul.f32 -0.5, %v784_v61 }
 0x2e7   : > { %803 = vadd.xlane.f32.xlu1 %v797_v62  ;;  %v798_v2 = vadd.f32 %v794_v54, %v790_v63 }
 0x2e8   : > { %799 = vadd.xlane.f32.xlu0 %v795_v0  ;;  %v796_v3 = vadd.f32 %v794_v54, %v788_v1 }
 0x2eb   : > { %805 = vadd.xlane.f32.xlu1 %v798_v2 }
 0x2ec   : > { %801 = vadd.xlane.f32.xlu0 %v796_v3 }
 0x2fc   : > { %811 = vrot.lane.b32.xlu1 %v1088_v38, %s1153_s27 }
 0x300   : > { %813 = vrot.lane.b32.xlu1 %v1082_v33, %s1153_s27 }
 0x302   : > { %809 = vrot.lane.b32.xlu0 %v1084_v34, %s1153_s27 }
 0x304   : > { %815 = vrot.lane.b32.xlu1 %v1086_v36, %s1153_s27  ;;  %s1095_s27 = scalar_lea.vmem %s1094_s26, 1024 }
 0x305   : > { %p1097_p1 = scmp.lt.s32.totalorder %s1095_s27, %s1089_s13 }
 0x307   : > { %p1098_p2 = por %p1097_p1, %p1096_p0 }
 0x309   : > { %p1099_p3 = pnand %p1098_p2, %p1092_p13 }
 0x374   : > { %v804_v4 = vpop.xlane.xlu1 %803 }
 0x375   : > { %v800_v5 = vpop.xlane.xlu0 %799  ;;  %v824_v19 = vsel %vm821_vm11, %v804_v4, 0.0 }
 0x376   : > { %v822_v14 = vsel %vm821_vm11, %v800_v5, 0.0 }
 0x378   : > { %v806_v7 = vpop.xlane.xlu1 %805 }
 0x379   : > { %v802_v8 = vpop.xlane.xlu0 %801  ;;  %v825_v23 = vsel %vm821_vm11, %v806_v7, 0.0 }
 0x37a   : > { %v823_v12 = vsel %vm821_vm11, %v802_v8, 0.0 }
 0x37c   : > { %v812_v9 = vpop.permute.xlu1 %811 }
 0x37d   : > { %v818_v10 = vadd.f32 %v959_v47, %v812_v9  ;;  %v810_v11 = vpop.permute.xlu0 %809 }
 0x37e   : > { %v817_v13 = vadd.f32 %v958_v43, %v810_v11 }
 0x37f   : > { %v827_v15 = vadd.f32 %v823_v12, %v818_v10 }
 0x380   : > { %v826_v16 = vadd.f32 %v822_v14, %v817_v13  ;;  %v814_v17 = vpop.permute.xlu1 %813 }
 0x381   : > { %831 = vst [vmem:[%s342_s14 + $0x8] sm:$0xff] %v827_v15  ;;  %v819_v18 = vadd.f32 %v960_v40, %v814_v17 }
 0x382   : > { %830 = vst [vmem:[%s342_s14] sm:$0xff] %v826_v16 }
 0x383   : > { %v828_v20 = vadd.f32 %v824_v19, %v819_v18 }
 0x384   : > { %v816_v21 = vpop.permute.xlu1 %815 }
 0x385   : > { %832 = vst [vmem:[%s342_s14 + $0x10] sm:$0xff] %v828_v20  ;;  %v820_v22 = vadd.f32 %v961_v44, %v816_v21 }
 0x387   : > { %v829_v24 = vadd.f32 %v825_v23, %v820_v22 }
 0x389   : > { %833 = vst [vmem:[%s342_s14 + $0x18] sm:$0xff] %v829_v24 }
 0x38a   : > { %1102 = shalt.err (!%p1099_p3)
}
 0x38b   : > { %s1103_s28 = scalar_lea.hbm %s1321_s24, 512  ;;  %s1107_s17 = scalar_lea.hbm %s1373_s9, 1024 }
 0x38c   : > { %p1104_p4 = scmp.ne.s32.totalorder %s1321_s24, %s1103_s28  ;;  %p1108_p9 = scmp.lt.u32.totalorder %s1321_s24, %s1373_s9 }
 0x38d   : > { %p1109_p10 = scmp.lt.u32.totalorder %s1107_s17, %s1103_s28  ;;  %p1111_p12 = scmp.lt.u32.totalorder %s1103_s28, %s1321_s24 }
 0x38e   : > { %p1105_p7 = pnand %p1104_p4, %p1245_p5 }
 0x38f   : > { %p1110_p11 = por %p1109_p10, %p1108_p9 }
 0x390   : > { %p1106_p8 = pneg %p1105_p7 }
 0x391   : > { %p1112_p13 = por %p1111_p12, %p1110_p11 }
 0x393   : > { %p1113_p0 = pnand %p1112_p13, %p1106_p8 }
 0x395   : > { %1116 = shalt.err (!%p1113_p0)
}
 0x396   : > { %s1155_s13 = smov 128   ;;  %s1156_s23 = smov 8  }
 0x397   : > { %1017 = dma.vmem_to_hbm [thread:$0]  (%p1245_p5), %s1316_s16, 512, %s1321_s24, %s1323_s25, %s1155_s13, %s1155_s13, %s1156_s23  }
 0x398 PF: > { %p1023_p1 = scmp.ge.s32.totalorder %s1151_s12, 2  ;;  %s863_s26 = sand.u32 1, %s1139_s30  }
 0x399   : > { %s864_s27 = scalar_lea.sflag [#allocation3], %s863_s26 }
 0x39a   : > { %p1020_p2 = pnand %p1023_p1, %p1249_p6 }
 0x39c   : > { %1134 = dma.done.wait (!%p1020_p2), %s864_s27, 512  }
 0x39d   : > { %1136 = vsyncadd (!%p1020_p2), %s864_s27, 4294966784  ;;  %p19_p3 = scmp.ge.s32.totalorder %s1232_s15, 4   ;;  %s1376_s30 = smov %s1143_s10 }
 0x39e   : > { %s1377_s10 = smov %s1147_s11  ;;  %s1378_s11 = smov %s1243_s18 }
 0x39f   : > { %s1379_s12 = smov %s1232_s15  ;;  %21 = sbr.rel (!%p19_p3) target bundleno = 3 (0x3), region = 94 }
 0x3a6   :  { %869 = vsyncpa [#allocation3], 1 }
 0x3a7   :  { %871 = vsyncpa [#allocation3 + $0x1], 1 }

</bundles_post_ra>
